<compile_context>
chip_gen: v7x
topology: tpu7x:2x2x1
jax: 0.10.0
libtpu: 0.0.40
codegen_flags: <defaults>
</compile_context>

<pallas_src>
import functools

import jax
import jax.numpy as jnp
from jax.experimental import pallas as pl
from jax.experimental.pallas import tpu as pltpu


def _vmem_capacity_bytes() -> int:
    """Physical VMEM per core (generation-aware), with a safe fallback."""
    try:
        info = pltpu.get_tpu_info()
        cap = getattr(info, "vmem_capacity_bytes", None)
        if cap:
            return int(cap)
    except Exception:  # pragma: no cover - query can fail off-TPU
        pass
    return 64 << 20  # v7x-sized fallback is safe on every generation


def _focal_loss_kernel(x_ref, t_ref, out_ref, m_ref, l_ref, xt_ref, *,
                       gamma: float, n_rows: int, c_total: int,
                       tile_rows: int, tile_cols: int, num_c_tiles: int,
                       mask_rows: bool, mask_cols: bool):
    row_step = pl.program_id(0)
    c_step = pl.program_id(1)

    xv = x_ref[...]            # (TN, TC) logits, native dtype (bf16 stays bf16)
    t = t_ref[...]             # (TN, 1) int32 labels

    # Global class ids for this C tile (offset only needed when C is tiled).
    cls = jax.lax.broadcasted_iota(jnp.int32, xv.shape, 1)
    if num_c_tiles > 1:
        cls = cls + c_step * tile_cols

    # Ragged last C tile: neutralize out-of-range columns before max / exp.
    if mask_cols:
        xv = jnp.where(cls < c_total, xv, jnp.array(-1e30, dtype=xv.dtype))

    # Gather the target-class logit for this C tile (native-dtype select;
    # exactly one column matches, so the lane sum is exact).
    # NOTE: out-of-range / negative labels would gather 0 here (reference
    # one_hot gives a zero row); the module spec assumes valid labels.
    gathered = jnp.sum(jnp.where(cls == t, xv, jnp.zeros_like(xv)),
                       axis=-1, keepdims=True).astype(jnp.float32)
    tile_max = jnp.max(xv, axis=-1, keepdims=True).astype(jnp.float32)

    if num_c_tiles == 1:
        # Single-pass fast path: no scratch carry, no rescale.
        m_new = tile_max
        e = jnp.exp(xv.astype(jnp.float32) - m_new)
        l_new = jnp.sum(e, axis=-1, keepdims=True)
        x_t = gathered
    else:
        # Online (flash-style) logsumexp across C tiles, carried in scratch.
        @pl.when(c_step == 0)
        def _init():
            m_ref[...] = jnp.full((tile_rows, 1), -1e30, jnp.float32)
            l_ref[...] = jnp.zeros((tile_rows, 1), jnp.float32)
            xt_ref[...] = jnp.zeros((tile_rows, 1), jnp.float32)

        m_prev = m_ref[...]
        m_new = jnp.maximum(m_prev, tile_max)
        e = jnp.exp(xv.astype(jnp.float32) - m_new)
        l_new = l_ref[...] * jnp.exp(m_prev - m_new) + jnp.sum(
            e, axis=-1, keepdims=True)
        x_t = xt_ref[...] + gathered
        m_ref[...] = m_new
        l_ref[...] = l_new
        xt_ref[...] = x_t

    def _finalize():
        log_p = x_t - m_new - jnp.log(l_new)          # (TN, 1) log p_target
        loss_rows = -log_p
        if gamma != 0:
            p_t = jnp.exp(log_p)                      # (TN, 1) only
            one_minus = 1.0 - p_t
            if float(gamma).is_integer() and 0 < gamma <= 8:
                w = one_minus
                for _ in range(int(gamma) - 1):       # VPU multiplies only
                    w = w * one_minus
            else:
                w = jnp.power(one_minus, jnp.float32(gamma))
            loss_rows = loss_rows * w
        if mask_rows:
            # Select (not multiply) so garbage rows of the last partial row
            # tile cannot propagate inf/NaN into the partial sum.
            row_ids = row_step * tile_rows + jax.lax.broadcasted_iota(
                jnp.int32, (tile_rows, 1), 0)
            loss_rows = jnp.where(row_ids < n_rows, loss_rows, 0.0)
        # Per-row-tile partial sum; 1/N and the cross-tile reduction are
        # hoisted to the wrapper (loop invariant).
        out_ref[...] = jnp.sum(loss_rows).reshape(1, 1, 1)

    if num_c_tiles == 1:
        _finalize()
    else:
        pl.when(c_step == num_c_tiles - 1)(_finalize)


def focal_loss(x: jax.Array, target: jax.Array, gamma: float = 0.0,
               vmem_budget_bytes: int | None = None) -> jax.Array:
    """Pallas TPU implementation of FocalLoss.forward(x, target)."""
    n, c = x.shape
    t = target.reshape(n, 1).astype(jnp.int32)
    itemsize = jnp.dtype(x.dtype).itemsize

    # ---- generation-aware working-set budget -------------------------------
    vmem_cap = _vmem_capacity_bytes()
    if vmem_budget_bytes is None:
        # ~65% of physical VMEM (≈42 MiB on v7x, capped at 96 MiB on v5e/v6e).
        budget = min(int(0.65 * vmem_cap), 96 << 20)
    else:
        budget = int(vmem_budget_bytes)   # test hook to force tiled paths

    # Bytes of VMEM per logits-tile element: 2 pipeline buffers (native dtype)
    # plus ~3 full-tile f32/int32 temporaries (cast, exp, iota/select).
    bytes_per_elem = 2 * itemsize + 12
    max_tile_elems = max(8 * 128, budget // bytes_per_elem)

    # ---- class (lane) tile --------------------------------------------------
    if c <= 128 or c * 256 <= max_tile_elems:
        tc = c                                   # whole row in one tile
    else:
        # Tile C (multiple of 128) so that >=512 rows still fit per tile.
        tc = max(128, min(((max_tile_elems // 512) // 128) * 128,
                          (c // 128) * 128))
    num_c_tiles = pl.cdiv(c, tc)

    # ---- row (sublane) tile -------------------------------------------------
    tn_cap = max(8, min(2048, ((max_tile_elems // tc) // 8) * 8))
    tn = n if n <= tn_cap else tn_cap            # full extent needs no 8-align
    num_row_tiles = pl.cdiv(n, tn)

    mask_rows = (n % tn) != 0
    mask_cols = (c % tc) != 0

    # Scoped VMEM limit: above the 32 MiB default on v5e/v6e (128 MiB phys),
    # but kept well under v7x's 64 MiB physical ceiling.
    vmem_limit = int(min(int(0.92 * vmem_cap),
                         max(32 << 20, int(1.25 * budget))))
    vmem_limit = max(vmem_limit, 16 << 20)

    partials = pl.pallas_call(
        functools.partial(_focal_loss_kernel, gamma=float(gamma), n_rows=n,
                          c_total=c, tile_rows=tn, tile_cols=tc,
                          num_c_tiles=num_c_tiles, mask_rows=mask_rows,
                          mask_cols=mask_cols),
        out_shape=jax.ShapeDtypeStruct((num_row_tiles, 1, 1), jnp.float32),
        grid_spec=pltpu.PrefetchScalarGridSpec(
            num_scalar_prefetch=0,
            grid=(num_row_tiles, num_c_tiles),
            in_specs=[
                pl.BlockSpec((tn, tc), lambda i, j: (i, j)),
                pl.BlockSpec((tn, 1), lambda i, j: (i, 0)),
            ],
            # Per-row-tile partial sums; last two dims are full extent (1,1)
            # so only the unconstrained leading dim is tiled -> row axis can
            # be "parallel" (megacore on v7x) without a shared accumulator.
            out_specs=pl.BlockSpec((1, 1, 1), lambda i, j: (i, 0, 0)),
            scratch_shapes=[
                pltpu.VMEM((tn, 1), jnp.float32),   # running row max
                pltpu.VMEM((tn, 1), jnp.float32),   # running softmax denom
                pltpu.VMEM((tn, 1), jnp.float32),   # gathered target logit
            ],
        ),
        compiler_params=pltpu.CompilerParams(
            dimension_semantics=("parallel", "arbitrary"),
            vmem_limit_bytes=vmem_limit,
        ),
    )(x, t)

    # Hoisted epilogue: tiny cross-tile reduction + single 1/N scale.
    return jnp.sum(partials) / jnp.float32(n)


def _reference(x, target, gamma=0.0):
    """Plain-JAX reference mirroring the PyTorch forward (NaN-safe form)."""
    n, c = x.shape
    y = jax.nn.one_hot(target, c, dtype=jnp.float32)
    logp = jax.nn.log_softmax(x.astype(jnp.float32), axis=1)
    p = jnp.exp(logp)
    loss = -1.0 * y * logp
    loss = loss * (1.0 - p) ** gamma / float(n)
    return loss.sum()


if __name__ == "__main__":
    key = jax.random.PRNGKey(0)
    k1, k2, k3, k4, k5, k6 = jax.random.split(key, 6)

    # Case 1: single-tile fast path, gamma = 0 (module defaults).
    n1, c1 = 8, 32
    x1 = jax.random.normal(k1, (n1, c1), dtype=jnp.float32)
    t1 = jax.random.randint(k2, (n1,), 0, c1, dtype=jnp.int32)
    out1 = jax.block_until_ready(focal_loss(x1, t1, gamma=0.0))
    ref1 = _reference(x1, t1, gamma=0.0)
    assert jnp.allclose(out1, ref1, rtol=1e-5, atol=1e-6), (out1, ref1)

    # Case 2: gamma = 2 (unrolled integer focal weight), still one tile.
    n2, c2 = 24, 16
    x2 = jax.random.normal(k3, (n2, c2), dtype=jnp.float32)
    t2 = jax.random.randint(k4, (n2,), 0, c2, dtype=jnp.int32)
    out2 = jax.block_until_ready(focal_loss(x2, t2, gamma=2.0))
    ref2 = _reference(x2, t2, gamma=2.0)
    assert jnp.allclose(out2, ref2, rtol=1e-5, atol=1e-6), (out2, ref2)

    # Case 3: forced-tiny VMEM budget -> multiple row tiles (ragged last row
    # tile) AND multiple class tiles (ragged last C tile), exercising the
    # online-logsumexp, column-mask and row-mask paths at small shapes.
    n3, c3 = 20, 200
    x3 = jax.random.normal(k5, (n3, c3), dtype=jnp.float32)
    t3 = jax.random.randint(k6, (n3,), 0, c3, dtype=jnp.int32)
    out3 = jax.block_until_ready(
        focal_loss(x3, t3, gamma=2.0, vmem_budget_bytes=32 * 1024))
    ref3 = _reference(x3, t3, gamma=2.0)
    assert jnp.allclose(out3, ref3, rtol=1e-5, atol=1e-6), (out3, ref3)

    # Case 4: non-integer gamma (jnp.power path) on the same tiled config.
    out4 = jax.block_until_ready(
        focal_loss(x3, t3, gamma=0.5, vmem_budget_bytes=32 * 1024))
    ref4 = _reference(x3, t3, gamma=0.5)
    assert jnp.allclose(out4, ref4, rtol=1e-5, atol=1e-6), (out4, ref4)

    print("KERNEL_OK")
</pallas_src>

<mosaic_0001>
module attributes {stable_mosaic.version = 11 : i64} {
  func.func @_focal_loss_kernel(%arg0: i32, %arg1: i32, %arg2: memref<8x32xf32, #tpu.memory_space<vmem>>, %arg3: memref<8x1xi32, #tpu.memory_space<vmem>>, %arg4: memref<1x1x1xf32, #tpu.memory_space<vmem>>, %arg5: memref<8x1xf32, #tpu.memory_space<vmem>>, %arg6: memref<8x1xf32, #tpu.memory_space<vmem>>, %arg7: memref<8x1xf32, #tpu.memory_space<vmem>>) attributes {dimension_semantics = [#tpu.dimension_semantics<parallel>, #tpu.dimension_semantics<arbitrary>], iteration_bounds = array<i64: 1, 1>, scalar_prefetch = 0 : i64, scratch_operands = 3 : i64, tpu.core_type = #tpu.core_type<tc>, window_params = [{transform_indices = @transform_0, window_bounds = array<i64: 8, 32>}, {transform_indices = @transform_1, window_bounds = array<i64: 8, 1>}, {transform_indices = @transform_2, window_bounds = array<i64: 1, 1, 1>}]} {
    %c0 = arith.constant 0 : index
    %c0_0 = arith.constant 0 : index
    %0 = vector.load %arg2[%c0, %c0_0] : memref<8x32xf32, #tpu.memory_space<vmem>>, vector<8x32xf32>
    %c0_1 = arith.constant 0 : index
    %c0_2 = arith.constant 0 : index
    %1 = vector.load %arg3[%c0_1, %c0_2] : memref<8x1xi32, #tpu.memory_space<vmem>>, vector<8x1xi32>
    %2 = tpu.iota {dimensions = array<i32: 1>} : vector<8x32xi32>
    %3 = vector.broadcast %1 : vector<8x1xi32> to vector<8x32xi32>
    %4 = arith.cmpi eq, %2, %3 : vector<8x32xi32>
    %cst = arith.constant 0.000000e+00 : f32
    %5 = vector.broadcast %cst : f32 to vector<8x32xf32>
    %6 = arith.select %4, %0, %5 : vector<8x32xi1>, vector<8x32xf32>
    %cst_3 = arith.constant dense<0.000000e+00> : vector<8xf32>
    %7 = vector.multi_reduction <add>, %6, %cst_3 [1] : vector<8x32xf32> to vector<8xf32>
    %8 = vector.shape_cast %7 : vector<8xf32> to vector<8x1xf32>
    %cst_4 = arith.constant dense<0xFF800000> : vector<8xf32>
    %9 = vector.multi_reduction <maximumf>, %0, %cst_4 [1] : vector<8x32xf32> to vector<8xf32>
    %10 = vector.shape_cast %9 : vector<8xf32> to vector<8x1xf32>
    %11 = vector.broadcast %10 : vector<8x1xf32> to vector<8x32xf32>
    %12 = arith.subf %0, %11 : vector<8x32xf32>
    %13 = math.exp %12 : vector<8x32xf32>
    %cst_5 = arith.constant dense<0.000000e+00> : vector<8xf32>
    %14 = vector.multi_reduction <add>, %13, %cst_5 [1] : vector<8x32xf32> to vector<8xf32>
    %15 = vector.shape_cast %14 : vector<8xf32> to vector<8x1xf32>
    %16 = arith.subf %8, %10 : vector<8x1xf32>
    %17 = math.log %15 : vector<8x1xf32>
    %18 = arith.subf %16, %17 : vector<8x1xf32>
    %cst_6 = arith.constant 0.000000e+00 : f32
    %19 = vector.broadcast %cst_6 : f32 to vector<8x1xf32>
    %20 = arith.subf %19, %18 : vector<8x1xf32>
    %21 = vector.shape_cast %20 : vector<8x1xf32> to vector<1x8x1xf32>
    %cst_7 = arith.constant dense<0.000000e+00> : vector<1xf32>
    %22 = vector.multi_reduction <add>, %21, %cst_7 [1, 2] : vector<1x8x1xf32> to vector<1xf32>
    %23 = vector.shape_cast %22 : vector<1xf32> to vector<1x1x1xf32>
    %24 = vector.extract %23[0, 0, 0] : f32 from vector<1x1x1xf32>
    %25 = vector.broadcast %24 : f32 to vector<1x1x1xf32>
    %c0_8 = arith.constant 0 : index
    %c0_9 = arith.constant 0 : index
    %c0_10 = arith.constant 0 : index
    %26 = vector.load %arg4[%c0_8, %c0_9, %c0_10] : memref<1x1x1xf32, #tpu.memory_space<vmem>>, vector<1x1x1xf32>
    tpu.vector_store %arg4[%c0_8, %c0_9, %c0_10], %25 {strides = array<i32>} : memref<1x1x1xf32, #tpu.memory_space<vmem>>, vector<1x1x1xf32>,
    return
  }
  func.func @transform_0(%arg0: i32, %arg1: i32) -> (i32, i32) {
    %c0_i32 = arith.constant 0 : i32
    return %arg0, %arg1 : i32, i32
  }
  func.func @transform_1(%arg0: i32, %arg1: i32) -> (i32, i32) {
    %c0_i32 = arith.constant 0 : i32
    %c0_i32_0 = arith.constant 0 : i32
    return %arg0, %c0_i32 : i32, i32
  }
  func.func @transform_2(%arg0: i32, %arg1: i32) -> (i32, i32, i32) {
    %c0_i32 = arith.constant 0 : i32
    %c0_i32_0 = arith.constant 0 : i32
    %c0_i32_1 = arith.constant 0 : i32
    return %arg0, %c0_i32, %c0_i32_0 : i32, i32, i32
  }
}

</mosaic_0001>

<bundles_post_ra>
// kernel: tpu_custom_call.1
= control target key start
LH: loop header
LB: loop body
LE: loop exit
PB: predicated region body
PF: predicated region fallthrough
CT: control target
= control target key end

     0   :  { %vm21_vm0 = vcmask 261120   ;;  %s138_s0 = inlined_call_operand.vmem [shape: f32[8,32], index: 0, kind: input, shape index: {}]   ;;  %s139_s1 = inlined_call_operand.vmem [shape: s32[8,1], index: 1, kind: input, shape index: {}]   ;;  %s140_s2 = inlined_call_operand.hbm [shape: f32[1,1,1], index: 2, kind: output, shape index: {}]  }
   0x1   :  { %v12_v0 = vld [vmem:[%s138_s0] sm:$0xff] }
   0x2   :  { %7 = vsyncpa [#allocation6], 0  ;;  %v25_v1 = vsel %vm21_vm0, %v12_v0, -inf  ;;  %v100_v2 = vmov 0   ;;  %v13_v3 = vld [vmem:[%s139_s1] sm:$0xff]  ;;  %v14_v7 = vlaneseq  ;;  %vm39_vm2 = vcmask 7168  }
   0x3   :  { %71 = vset.pattern.permute.xlu0 %v100_v2  ;;  %s101_s0 = smov [#allocation5]   ;;  %vm51_vm3 = vcmask 0  }
   0x4   :  { %26 = vmax.xlane.f32.xlu0 %v25_v1  ;;  %v15_v8 = vand.u32 127, %v14_v7  ;;  %s59_s1 = sshll.u32 %s101_s0, 4  ;;  %s60_s1 = int_to_ptr.vmem [resolvable:$true] %s59_s1 }
   0x5   :  { %s76_s14 = scalar_lea.vmem %s60_s1, 16  ;;  %s80_s15 = scalar_lea.vmem %s60_s1, 32 }
   0x6   :  { %p77_p0 = scmp.ne.s32.totalorder %s60_s1, %s76_s14  ;;  %p81_p1 = scmp.lt.s32.totalorder %s60_s1, %s60_s1 }
   0x7   :  { %p82_p2 = scmp.lt.s32.totalorder %s80_s15, %s76_s14 }
   0x9   :  { %p83_p3 = por %p82_p2, %p81_p1 }
   0xb   :  { %p84_p4 = pnand %p83_p3, %p77_p0 }
  0x1a   :  { %17 = vperm.xlu0 %71, %v13_v3  }
  0x91   :  { %v27_v4 = vpop.xlane.xlu0 %26 }
  0x92   :  { %v28_v5 = vsub.f32 %v12_v0, %v27_v4 }
  0x94   :  { %v29_v6 = vmul.f32 1.442695, %v28_v5 }
  0x96   :  { %72 = vpow2.f32 %v29_v6 }
  0x99   :  { %v18_v9 = vpop.permute.xlu0 %17 }
  0x9a   :  { %vm19_vm1 = vcmp.eq.s32.totalorder %v15_v8, %v18_v9 }
  0x9b   :  { %v20_v11 = vsel %vm19_vm1, %v12_v0, 0.0 }
  0x9c   :  { %v22_v13 = vsel %vm21_vm0, %v20_v11, 0.0 }
  0xa0   :  { %v73_v10 = vpop.eup %72 }
  0xa1   :  { %v31_v12 = vsel %vm21_vm0, %v73_v10, 0.0 }
  0xa2   :  { %32 = vadd.xlane.f32.xlu1 %v31_v12 }
  0xa6   :  { %23 = vadd.xlane.f32.xlu1 %v22_v13 }
 0x12f   :  { %v33_v14 = vpop.xlane.xlu1 %32 }
 0x130   :  { %74 = vlog2.f32 %v33_v14 }
 0x133   :  { %v24_v15 = vpop.xlane.xlu1 %23 }
 0x134   :  { %v34_v18 = vsub.f32 %v24_v15, %v27_v4 }
 0x13a   :  { %v75_v16 = vpop.eup %74 }
 0x13b   :  { %v36_v17 = vmul.f32 0.6931472, %v75_v16 }
 0x13d   :  { %v37_v19 = vsub.f32 %v34_v18, %v36_v17 }
 0x13f   :  { %v38_v20 = vsub.f32 0.0, %v37_v19 }
 0x141   :  { %v40_v21 = vsel %vm39_vm2, %v38_v20, 0.0 }
 0x142   :  { %41 = vadd.xlane.f32.xlu1 %v40_v21 }
 0x1cf   :  { %v42_v22 = vpop.xlane.xlu1 %41 }
 0x1d0   :  { %v43_v23 = vrot.slane %v42_v22, 4 }
 0x1d2   :  { %v44_v24 = vadd.f32 %v43_v23, %v42_v22 }
 0x1d4   :  { %v45_v25 = vrot.slane %v44_v24, 2 }
 0x1d6   :  { %v46_v26 = vadd.f32 %v45_v25, %v44_v24 }
 0x1d8   :  { %v47_v27 = vrot.slane %v46_v26, 1 }
 0x1da   :  { %v48_v28 = vadd.f32 %v47_v27, %v46_v26 }
 0x1dc   :  { %67 = vpush %v48_v28 }
 0x20d   :  { %s68_s13 = spop %67 }
 0x20e   :  { %v50_v29 = vstv %s68_s13 }
 0x20f   :  { %52 = vst.msk [vmem:[#allocation5] sm:$0x1] %vm51_vm3, %v50_v29 }
 0x210   :  { %87 = shalt.err (!%p84_p4)
}
 0x211   :  { %s88_s18 = scalar_lea.hbm %s140_s2, 16 }
 0x212   :  { %p89_p5 = scmp.ne.s32.totalorder %s140_s2, %s88_s18  ;;  %p92_p6 = scmp.lt.u32.totalorder %s88_s18, %s140_s2 }
 0x214   :  { %p94_p7 = pnand %p92_p6, %p89_p5 }
 0x216   :  { %97 = shalt.err (!%p94_p7)
}
 0x217   :  { %62 = dma.vmem_to_hbm [thread:$0]  %s60_s1, 16, %s140_s2, [#allocation6]  }
 0x218   :  { %98 = dma.done.wait [#allocation6], 16  }
 0x219   :  { %99 = vsyncadd [#allocation6], 4294967280 }
 0x21a   :  { %66 = vsyncpa [#allocation6], 1 }

</bundles_post_ra>
